<compile_context>
chip_gen: v7x
topology: tpu7x:2x2x1
jax: 0.10.0
libtpu: 0.0.40
codegen_flags: <defaults>
</compile_context>

<pallas_src>
import functools

import numpy as np
import jax
import jax.numpy as jnp
from jax.experimental import pallas as pl
from jax.experimental.pallas import tpu as pltpu

BN_EPS = 1e-5        # nn.BatchNorm2d default eps
APRELU_EPS = 1e-8    # module's eps for the inhibit division


def _vmem_capacity_bytes():
    try:
        return int(pltpu.get_tpu_info().vmem_capacity_bytes)
    except Exception:
        return 64 * 1024 * 1024          # v7x-safe fallback


_VMEM_CAP = _vmem_capacity_bytes()
# ~48 MiB on v7x (64 MiB physical), ~96 MiB on v5e/v6e (128 MiB physical).
VMEM_LIMIT = max(32 * 1024 * 1024, min((_VMEM_CAP * 3) // 4, 96 * 1024 * 1024))
# Per-block byte budget for the streaming path (x tile per buffer).
_BLOCK_BUDGET = max(2 * 1024 * 1024, min(8 * 1024 * 1024, VMEM_LIMIT // 8))


def _round_up(x, m):
    return ((x + m - 1) // m) * m


def _maybe_buffered_spec(block, index_map, bufs):
    """BlockSpec with pipeline_mode=Buffered(bufs) when supported, else plain."""
    if bufs is None:
        return pl.BlockSpec(block, index_map)
    try:
        return pl.BlockSpec(block, index_map, pipeline_mode=pl.Buffered(bufs))
    except Exception:
        return pl.BlockSpec(block, index_map)


# --------------------------------------------------------------------------
# Gate: analysis1(bias) -> active ; analysis2(active) -> inhibit  (scalars).
# Purely bias-driven in the reference module -> plain JAX glue.
# --------------------------------------------------------------------------
def _gate(params):
    b = params["bias"]                                            # (1,)
    h1 = b @ params["w1a"].T + params["b1a"]                      # (a,)
    active = jax.nn.sigmoid(h1 @ params["w2a"].T + params["b2a"])  # (1,)
    h2 = active @ params["w1b"].T + params["b1b"]                 # (a,)
    inhibit = jax.nn.sigmoid(h2 @ params["w2b"].T + params["b2b"])  # (1,)
    return active[0], inhibit[0]


# --------------------------------------------------------------------------
# Fused path: whole (N, C, L) activation resident in VMEM; stats + BN +
# gate in a single kernel (saves one full HBM read of x).
# --------------------------------------------------------------------------
def _fused_kernel(scal_ref, g_ref, b_ref, x_ref, o_ref):
    x = x_ref[...].astype(jnp.float32)                 # (N, C, L)
    n_total = x.shape[0] * x.shape[2]                  # static N*L
    s = jnp.sum(jnp.sum(x, axis=2, keepdims=True), axis=0, keepdims=True)
    mean = s * (1.0 / n_total)                         # (1, C, 1)
    xc = x - mean
    v = jnp.sum(jnp.sum(xc * xc, axis=2, keepdims=True), axis=0, keepdims=True)
    rstd = jax.lax.rsqrt(v * (1.0 / n_total) + BN_EPS)  # (1, C, 1)
    y = xc * (g_ref[...] * rstd) + b_ref[...]
    pos = scal_ref[0]                                  # active / (inhibit+eps)
    neg = scal_ref[1]                                  # (1-active) / (inhibit+eps)
    o_ref[...] = (y * jnp.where(y >= 0.0, pos, neg)).astype(o_ref.dtype)


# --------------------------------------------------------------------------
# Streaming pass 1: per-(row-block, lane-block) partial mean / centered M2.
# Fully parallel grid (no scratch, no loop-carried chain); tail lane block
# masked with the true element count.
# --------------------------------------------------------------------------
def _make_stats_kernel(L, tile_l, need_mask):
    def kernel(x_ref, mean_ref, m2_ref):
        x = x_ref[...].astype(jnp.float32)             # (tile_r, tile_l)
        if need_mask:
            li = pl.program_id(1)
            valid = jnp.minimum(L - li * tile_l, tile_l)
            lane = jax.lax.broadcasted_iota(jnp.int32, x.shape, 1)
            mask = lane < valid
            cnt = jnp.maximum(valid, 1).astype(jnp.float32)
            xs = jnp.where(mask, x, 0.0)
            m = jnp.sum(xs, axis=-1, keepdims=True) / cnt
            c = jnp.where(mask, x - m, 0.0)
        else:
            m = jnp.mean(x, axis=-1, keepdims=True)
            c = x - m
        m2 = jnp.sum(c * c, axis=-1, keepdims=True)
        mean_ref[...] = m[None]                        # (1, tile_r, 1)
        m2_ref[...] = m2[None]
    return kernel


# --------------------------------------------------------------------------
# Streaming pass 2: normalize + APReLU gate (pure elementwise, parallel).
# --------------------------------------------------------------------------
def _apply_kernel(scal_ref, x_ref, scale_ref, shift_ref, o_ref):
    x = x_ref[...].astype(jnp.float32)
    y = x * scale_ref[...] + shift_ref[...]
    pos = scal_ref[0]
    neg = scal_ref[1]
    o_ref[...] = (y * jnp.where(y >= 0.0, pos, neg)).astype(o_ref.dtype)


@functools.partial(jax.jit, static_argnames=("force_two_pass",))
def aprelu_forward(x_nchw, params, force_two_pass=False):
    N, C, H, W = x_nchw.shape
    R, L = N * C, H * W
    in_dtype = x_nchw.dtype
    itemsize = jnp.dtype(in_dtype).itemsize

    # ---- gate scalars (tiny MLPs, plain JAX glue) ----
    active, inhibit = _gate(params)
    inv_inhibit = 1.0 / (inhibit + APRELU_EPS)
    pos = active * inv_inhibit
    neg = (1.0 - active) * inv_inhibit
    scal = jnp.stack([pos, neg]).astype(jnp.float32)   # (2,) -> SMEM

    gamma = params["gamma"].astype(jnp.float32)
    beta = params["beta"].astype(jnp.float32)

    # ------------- fused, VMEM-resident single-pass path -------------
    # rough VMEM need: in/out blocks (double-buffered) + a few f32 temps.
    fused_need = R * L * (4 * itemsize + 16)
    if (not force_two_pass) and fused_need <= int(VMEM_LIMIT * 0.85):
        x3 = x_nchw.reshape(N, C, L)                   # free reshape
        g3 = gamma.reshape(1, C, 1)
        b3 = beta.reshape(1, C, 1)
        out3 = pl.pallas_call(
            _fused_kernel,
            out_shape=jax.ShapeDtypeStruct((N, C, L), in_dtype),
            grid=(1,),
            in_specs=[
                pl.BlockSpec(memory_space=pltpu.SMEM),           # scal
                pl.BlockSpec((1, C, 1), lambda i: (0, 0, 0)),    # gamma
                pl.BlockSpec((1, C, 1), lambda i: (0, 0, 0)),    # beta
                pl.BlockSpec((N, C, L), lambda i: (0, 0, 0)),    # x (resident)
            ],
            out_specs=pl.BlockSpec((N, C, L), lambda i: (0, 0, 0)),
            compiler_params=pltpu.CompilerParams(
                dimension_semantics=("arbitrary",),
                vmem_limit_bytes=VMEM_LIMIT),
        )(scal, g3, b3, x3)
        return out3.reshape(N, C, H, W)

    # ------------- streaming two-pass path -------------
    x2d = x_nchw.reshape(R, L)                         # rows = (n, c) slabs

    sub = max(8, 32 // itemsize)                       # 8 f32, 16 bf16, 32 i8
    tile_r = min(_round_up(R, sub), 256)
    lane_full = _round_up(L, 128)
    tile_l = max(128, ((_BLOCK_BUDGET // (tile_r * itemsize)) // 128) * 128)
    tile_l = min(tile_l, lane_full)
    n_rb = pl.cdiv(R, tile_r)
    n_lb = pl.cdiv(L, tile_l)
    need_mask = (L % tile_l) != 0

    # ---- pass 1: partial per-(row, lane-block) stats, fully parallel ----
    part_mean, part_m2 = pl.pallas_call(
        _make_stats_kernel(L, tile_l, need_mask),
        out_shape=(jax.ShapeDtypeStruct((n_lb, R, 1), jnp.float32),
                   jax.ShapeDtypeStruct((n_lb, R, 1), jnp.float32)),
        grid=(n_rb, n_lb),
        in_specs=[pl.BlockSpec((tile_r, tile_l), lambda r, l: (r, l))],
        out_specs=(pl.BlockSpec((1, tile_r, 1), lambda r, l: (l, r, 0)),
                   pl.BlockSpec((1, tile_r, 1), lambda r, l: (l, r, 0))),
        compiler_params=pltpu.CompilerParams(
            dimension_semantics=("parallel", "parallel"),
            vmem_limit_bytes=VMEM_LIMIT),
    )(x2d)

    # ---- glue: count-weighted combine over (lane blocks, N) per channel ----
    starts = np.arange(n_lb, dtype=np.int64) * tile_l
    cnt_b = np.minimum(L - starts, tile_l).astype(np.float32)     # (n_lb,)
    w = jnp.asarray(cnt_b).reshape(n_lb, 1, 1)
    pm = part_mean.reshape(n_lb, N, C)
    p2 = part_m2.reshape(n_lb, N, C)
    total = float(N * L)
    mean_c = jnp.sum(pm * w, axis=(0, 1)) / total                  # (C,)
    m2_c = jnp.sum(p2, axis=(0, 1)) + jnp.sum(w * (pm - mean_c) ** 2, axis=(0, 1))
    var_c = m2_c / total                                           # biased
    rstd_c = jax.lax.rsqrt(var_c + BN_EPS)
    scale_c = gamma * rstd_c
    shift_c = beta - mean_c * scale_c
    scale_r = jnp.broadcast_to(scale_c[None, :], (N, C)).reshape(R, 1)
    shift_r = jnp.broadcast_to(shift_c[None, :], (N, C)).reshape(R, 1)

    # ---- pass 2: normalize + gate (elementwise, pipelined, parallel) ----
    bufs = 3 if (n_rb * n_lb) >= 3 else None
    out2d = pl.pallas_call(
        _apply_kernel,
        out_shape=jax.ShapeDtypeStruct((R, L), in_dtype),
        grid=(n_rb, n_lb),
        in_specs=[
            pl.BlockSpec(memory_space=pltpu.SMEM),                 # scalars
            _maybe_buffered_spec((tile_r, tile_l), lambda r, l: (r, l), bufs),
            pl.BlockSpec((tile_r, 1), lambda r, l: (r, 0)),        # scale
            pl.BlockSpec((tile_r, 1), lambda r, l: (r, 0)),        # shift
        ],
        out_specs=pl.BlockSpec((tile_r, tile_l), lambda r, l: (r, l)),
        compiler_params=pltpu.CompilerParams(
            dimension_semantics=("parallel", "parallel"),
            vmem_limit_bytes=VMEM_LIMIT),
    )(scal, x2d, scale_r, shift_r)

    return out2d.reshape(N, C, H, W)


def init_params(key, channels, a=10):
    ks = jax.random.split(key, 8)
    return {
        # analysis1: Linear(1, a), Linear(a, 1)
        "w1a": jax.random.normal(ks[0], (a, 1), jnp.float32) * 0.5,
        "b1a": jax.random.normal(ks[1], (a,), jnp.float32) * 0.1,
        "w2a": jax.random.normal(ks[2], (1, a), jnp.float32) * 0.5,
        "b2a": jax.random.normal(ks[3], (1,), jnp.float32) * 0.1,
        # analysis2: Linear(1, a), Linear(a, 1)
        "w1b": jax.random.normal(ks[4], (a, 1), jnp.float32) * 0.5,
        "b1b": jax.random.normal(ks[5], (a,), jnp.float32) * 0.1,
        "w2b": jax.random.normal(ks[6], (1, a), jnp.float32) * 0.5,
        "b2b": jax.random.normal(ks[7], (1,), jnp.float32) * 0.1,
        # module's learnable scalar bias (zeros, as in __init__)
        "bias": jnp.zeros((1,), jnp.float32),
        # BatchNorm2d affine params (default init: ones / zeros)
        "gamma": jnp.ones((channels,), jnp.float32),
        "beta": jnp.zeros((channels,), jnp.float32),
    }


def _reference(x_nchw, params):
    """Pure-JAX reference for a sanity check."""
    active, inhibit = _gate(params)
    mean = jnp.mean(x_nchw, axis=(0, 2, 3), keepdims=True)
    var = jnp.mean((x_nchw - mean) ** 2, axis=(0, 2, 3), keepdims=True)  # biased
    x_hat = (x_nchw - mean) / jnp.sqrt(var + BN_EPS)
    y = params["gamma"].reshape(1, -1, 1, 1) * x_hat + \
        params["beta"].reshape(1, -1, 1, 1)
    gated = jnp.where(y >= 0, active * y, (1.0 - active) * y)
    return gated / (inhibit + APRELU_EPS)


if __name__ == "__main__":
    key = jax.random.PRNGKey(0)
    k_x, k_p = jax.random.split(key)

    N, C, H, W = 2, 4, 16, 16
    x = jax.random.normal(k_x, (N, C, H, W), jnp.float32)
    params = init_params(k_p, C)

    ref = _reference(x, params)

    # Fused (VMEM-resident) path — the default for this small activation.
    out_fused = jax.block_until_ready(aprelu_forward(x, params))
    assert out_fused.shape == (N, C, H, W)
    assert jnp.allclose(out_fused, ref, atol=1e-4, rtol=1e-4)

    # Streaming two-pass path — exercised explicitly for coverage.
    out_stream = jax.block_until_ready(
        aprelu_forward(x, params, force_two_pass=True))
    assert jnp.allclose(out_stream, ref, atol=1e-4, rtol=1e-4)

    print("KERNEL_OK")
</pallas_src>

<mosaic_0001>
module attributes {stable_mosaic.version = 11 : i64} {
  func.func @_fused_kernel(%arg0: i32, %arg1: memref<2xf32, #tpu.memory_space<smem>>, %arg2: memref<1x4x1xf32, #tpu.memory_space<vmem>>, %arg3: memref<1x4x1xf32, #tpu.memory_space<vmem>>, %arg4: memref<2x4x256xf32, #tpu.memory_space<vmem>>, %arg5: memref<2x4x256xf32, #tpu.memory_space<vmem>>) attributes {dimension_semantics = [#tpu.dimension_semantics<arbitrary>], iteration_bounds = array<i64: 1>, scalar_prefetch = 0 : i64, scratch_operands = 0 : i64, tpu.core_type = #tpu.core_type<tc>, window_params = [{transform_indices = @transform_0, window_bounds = array<i64: 2>}, {pipeline_mode = #tpu.pipeline_mode<synchronous>, transform_indices = @transform_1, window_bounds = array<i64: 1, 4, 1>}, {pipeline_mode = #tpu.pipeline_mode<synchronous>, transform_indices = @transform_2, window_bounds = array<i64: 1, 4, 1>}, {pipeline_mode = #tpu.pipeline_mode<synchronous>, transform_indices = @transform_3, window_bounds = array<i64: 2, 4, 256>}, {pipeline_mode = #tpu.pipeline_mode<synchronous>, transform_indices = @transform_4, window_bounds = array<i64: 2, 4, 256>}]} {
    %c0 = arith.constant 0 : index
    %c0_0 = arith.constant 0 : index
    %c0_1 = arith.constant 0 : index
    %0 = vector.load %arg4[%c0, %c0_0, %c0_1] : memref<2x4x256xf32, #tpu.memory_space<vmem>>, vector<2x4x256xf32>
    %cst = arith.constant dense<0.000000e+00> : vector<2x4xf32>
    %1 = vector.multi_reduction <add>, %0, %cst [2] : vector<2x4x256xf32> to vector<2x4xf32>
    %2 = vector.shape_cast %1 : vector<2x4xf32> to vector<2x4x1xf32>
    %cst_2 = arith.constant dense<0.000000e+00> : vector<4x1xf32>
    %3 = vector.multi_reduction <add>, %2, %cst_2 [0] : vector<2x4x1xf32> to vector<4x1xf32>
    %4 = vector.shape_cast %3 : vector<4x1xf32> to vector<1x4x1xf32>
    %cst_3 = arith.constant 0.001953125 : f32
    %5 = vector.broadcast %cst_3 : f32 to vector<1x4x1xf32>
    %6 = arith.mulf %4, %5 : vector<1x4x1xf32>
    %7 = vector.broadcast %6 : vector<1x4x1xf32> to vector<2x4x256xf32>
    %8 = arith.subf %0, %7 : vector<2x4x256xf32>
    %9 = arith.mulf %8, %8 : vector<2x4x256xf32>
    %cst_4 = arith.constant dense<0.000000e+00> : vector<2x4xf32>
    %10 = vector.multi_reduction <add>, %9, %cst_4 [2] : vector<2x4x256xf32> to vector<2x4xf32>
    %11 = vector.shape_cast %10 : vector<2x4xf32> to vector<2x4x1xf32>
    %cst_5 = arith.constant dense<0.000000e+00> : vector<4x1xf32>
    %12 = vector.multi_reduction <add>, %11, %cst_5 [0] : vector<2x4x1xf32> to vector<4x1xf32>
    %13 = vector.shape_cast %12 : vector<4x1xf32> to vector<1x4x1xf32>
    %cst_6 = arith.constant 0.001953125 : f32
    %14 = vector.broadcast %cst_6 : f32 to vector<1x4x1xf32>
    %15 = arith.mulf %13, %14 : vector<1x4x1xf32>
    %cst_7 = arith.constant 9.99999974E-6 : f32
    %16 = vector.broadcast %cst_7 : f32 to vector<1x4x1xf32>
    %17 = arith.addf %15, %16 : vector<1x4x1xf32>
    %18 = math.rsqrt %17 : vector<1x4x1xf32>
    %c0_8 = arith.constant 0 : index
    %c0_9 = arith.constant 0 : index
    %c0_10 = arith.constant 0 : index
    %19 = vector.load %arg2[%c0_8, %c0_9, %c0_10] : memref<1x4x1xf32, #tpu.memory_space<vmem>>, vector<1x4x1xf32>
    %20 = arith.mulf %19, %18 : vector<1x4x1xf32>
    %21 = vector.broadcast %20 : vector<1x4x1xf32> to vector<2x4x256xf32>
    %22 = arith.mulf %8, %21 : vector<2x4x256xf32>
    %c0_11 = arith.constant 0 : index
    %c0_12 = arith.constant 0 : index
    %c0_13 = arith.constant 0 : index
    %23 = vector.load %arg3[%c0_11, %c0_12, %c0_13] : memref<1x4x1xf32, #tpu.memory_space<vmem>>, vector<1x4x1xf32>
    %24 = vector.broadcast %23 : vector<1x4x1xf32> to vector<2x4x256xf32>
    %25 = arith.addf %22, %24 : vector<2x4x256xf32>
    %c0_14 = arith.constant 0 : index
    %26 = memref.load %arg1[%c0_14] : memref<2xf32, #tpu.memory_space<smem>>
    %c1 = arith.constant 1 : index
    %27 = memref.load %arg1[%c1] : memref<2xf32, #tpu.memory_space<smem>>
    %cst_15 = arith.constant 0.000000e+00 : f32
    %28 = vector.broadcast %cst_15 : f32 to vector<2x4x256xf32>
    %29 = arith.cmpf oge, %25, %28 : vector<2x4x256xf32>
    %30 = vector.broadcast %26 : f32 to vector<2x4x256xf32>
    %31 = vector.broadcast %27 : f32 to vector<2x4x256xf32>
    %32 = arith.select %29, %30, %31 : vector<2x4x256xi1>, vector<2x4x256xf32>
    %33 = arith.mulf %25, %32 : vector<2x4x256xf32>
    %c0_16 = arith.constant 0 : index
    %c0_17 = arith.constant 0 : index
    %c0_18 = arith.constant 0 : index
    %34 = vector.load %arg5[%c0_16, %c0_17, %c0_18] : memref<2x4x256xf32, #tpu.memory_space<vmem>>, vector<2x4x256xf32>
    tpu.vector_store %arg5[%c0_16, %c0_17, %c0_18], %33 {strides = array<i32>} : memref<2x4x256xf32, #tpu.memory_space<vmem>>, vector<2x4x256xf32>,
    return
  }
  func.func @transform_0(%arg0: i32) -> i32 {
    %c0_i32 = arith.constant 0 : i32
    %c0_i32_0 = arith.constant 0 : i32
    return %c0_i32 : i32
  }
  func.func @transform_1(%arg0: i32) -> (i32, i32, i32) {
    %c0_i32 = arith.constant 0 : i32
    %c0_i32_0 = arith.constant 0 : i32
    %c0_i32_1 = arith.constant 0 : i32
    %c0_i32_2 = arith.constant 0 : i32
    return %c0_i32, %c0_i32_0, %c0_i32_1 : i32, i32, i32
  }
  func.func @transform_2(%arg0: i32) -> (i32, i32, i32) {
    %c0_i32 = arith.constant 0 : i32
    %c0_i32_0 = arith.constant 0 : i32
    %c0_i32_1 = arith.constant 0 : i32
    %c0_i32_2 = arith.constant 0 : i32
    return %c0_i32, %c0_i32_0, %c0_i32_1 : i32, i32, i32
  }
  func.func @transform_3(%arg0: i32) -> (i32, i32, i32) {
    %c0_i32 = arith.constant 0 : i32
    %c0_i32_0 = arith.constant 0 : i32
    %c0_i32_1 = arith.constant 0 : i32
    %c0_i32_2 = arith.constant 0 : i32
    return %c0_i32, %c0_i32_0, %c0_i32_1 : i32, i32, i32
  }
  func.func @transform_4(%arg0: i32) -> (i32, i32, i32) {
    %c0_i32 = arith.constant 0 : i32
    %c0_i32_0 = arith.constant 0 : i32
    %c0_i32_1 = arith.constant 0 : i32
    %c0_i32_2 = arith.constant 0 : i32
    return %c0_i32, %c0_i32_0, %c0_i32_1 : i32, i32, i32
  }
}

</mosaic_0001>

<bundles_post_ra>
// kernel: aprelu_forward.1
= control target key start
LH: loop header
LB: loop body
LE: loop exit
PB: predicated region body
PF: predicated region fallthrough
CT: control target
= control target key end

     0   :  { %9 = vsyncpa [#allocation3], 0  ;;  %s221_s0 = inlined_call_operand.vmem [shape: f32[2], index: 0, kind: input, shape index: {}]   ;;  %s222_s1 = inlined_call_operand.vmem [shape: f32[1,4,1], index: 1, kind: input, shape index: {}]   ;;  %s223_s2 = inlined_call_operand.vmem [shape: f32[1,4,1], index: 2, kind: input, shape index: {}]   ;;  %s224_s3 = inlined_call_operand.vmem [shape: f32[2,4,256], index: 3, kind: input, shape index: {}]   ;;  %s225_s4 = inlined_call_operand.vmem [shape: f32[2,4,256], index: 4, kind: output, shape index: {}]  }
   0x1   :  { %s16_s17 = sshll.u32 %s221_s0, 4  ;;  %s17_s17 = int_to_ptr.vmem [resolvable:$true] %s16_s17 }
   0x2   :  { %s146_s18 = scalar_lea.vmem %s17_s17, 16  ;;  %p151_p1 = scmp.lt.s32.totalorder %s17_s17, %s17_s17 }
   0x3   :  { %p147_p0 = scmp.ne.s32.totalorder %s17_s17, %s146_s18  ;;  %p152_p2 = scmp.lt.s32.totalorder %s146_s18, %s146_s18 }
   0x5   :  { %p153_p3 = por %p152_p2, %p151_p1 }
   0x7   :  { %p154_p4 = pnand %p153_p3, %p147_p0 }
   0x9   :  { %157 = shalt.err (!%p154_p4)
}
   0xa   :  { %s160_s19 = smov [#allocation2]  }
   0xb   :  { %19 = dma.vmem_to_smem %s17_s17, 16, %s160_s19, [#allocation3]  }
   0xc   :  { %158 = dma.done.wait [#allocation3], 16  }
   0xd   :  { %159 = vsyncadd [#allocation3], 4294967280 }
   0xe   :  { %29 = sfence }
   0xf   :  { %v30_v0 = vld [vmem:[%s224_s3] sm:$0xff]  ;;  %vm38_vm0 = vcmask 1043456   ;;  %v31_v1 = vld [vmem:[%s224_s3 + $0x8] sm:$0xff]  ;;  %v161_v10 = vmov 839922192   ;;  %v57_v12 = vlaneseq  ;;  %v162_v35 = vmov 0  }
  0x10   :  { %v34_v2 = vcombine.high %v30_v0, %v30_v0  ;;  %v39_v3 = vsel %vm38_vm0, %v30_v0, 0.0  ;;  %v35_v4 = vcombine.high %v31_v1, %v31_v1  ;;  %v44_v6 = vsel %vm38_vm0, %v31_v1, 0.0  ;;  %140 = vset.pattern.permute.xlu0 %v162_v35  ;;  %141 = vset.pattern.permute.xlu1 %v162_v35  ;;  %v104_v36 = vld [vmem:[%s223_s2] sm:$0xf]  ;;  %s119_s26 = sld [smem:[#allocation2]]  ;;  %s136_s2 = sld [smem:[#allocation2 + $0x1]] }
  0x11   :  { %v55_v11 = vunpack.c.l.s4 %v161_v10  ;;  %v58_v15 = vshrl.u32 %v57_v12, 7  ;;  %v88_v44 = vld [vmem:[%s222_s1] sm:$0xf] }
  0x12   :  { %v40_v5 = vsel %vm38_vm0, %v34_v2, 0.0  ;;  %v45_v7 = vsel %vm38_vm0, %v35_v4, 0.0 }
  0x13   :  { %v41_v8 = vadd.f32 %v40_v5, %v39_v3  ;;  %v46_v9 = vadd.f32 %v45_v7, %v44_v6  ;;  %v56_v14 = vunpack.c.0.s8 %v55_v11 }
  0x15   :  { %42 = vadd.xlane.f32.xlu0 %v41_v8  ;;  %v59_v19 = vsub.s32 %v56_v14, %v58_v15 }
  0x16   :  { %v123_v53 = vstv %s119_s26  ;;  %v124_v54 = vstv %s136_s2 }
  0x19   :  { %47 = vadd.xlane.f32.xlu0 %v46_v9 }
  0xa2   :  { %v43_v13 = vpop.xlane.xlu0 %42 }
  0xa3   :  { %v49_v17 = vsel %vm38_vm0, %v43_v13, 0.0 }
  0xa6   :  { %v48_v16 = vpop.xlane.xlu0 %47 }
  0xa7   :  { %v50_v18 = vsel %vm38_vm0, %v48_v16, 0.0 }
  0xa8   :  { %v51_v20 = vadd.f32 %v50_v18, %v49_v17 }
  0xaa   :  { %v52_v21 = vmul.f32 0.001953125, %v51_v20 }
  0xac   :  { %v60_v22 = vrot.slane %v52_v21, %v59_v19 }
  0xae   :  { %v63_v23 = vsub.f32 %v31_v1, %v60_v22  ;;  %v62_v24 = vsub.f32 %v30_v0, %v60_v22 }
  0xb0   :  { %v64_v25 = vmul.f32 %v62_v24, %v62_v24  ;;  %v65_v26 = vmul.f32 %v63_v23, %v63_v23 }
  0xb2   :  { %v68_v27 = vcombine.high %v64_v25, %v64_v25  ;;  %v69_v28 = vcombine.high %v65_v26, %v65_v26  ;;  %v72_v29 = vsel %vm38_vm0, %v64_v25, 0.0  ;;  %v77_v33 = vsel %vm38_vm0, %v65_v26, 0.0 }
  0xb4   :  { %v73_v30 = vsel %vm38_vm0, %v68_v27, 0.0  ;;  %v78_v32 = vsel %vm38_vm0, %v69_v28, 0.0 }
  0xb5   :  { %v74_v31 = vadd.f32 %v73_v30, %v72_v29  ;;  %v79_v34 = vadd.f32 %v78_v32, %v77_v33 }
  0xb7   :  { %75 = vadd.xlane.f32.xlu1 %v74_v31 }
  0xbb   :  { %80 = vadd.xlane.f32.xlu1 %v79_v34 }
  0xcc   :  { %107 = vperm.xlu1 %141, %v104_v36  }
 0x144   :  { %v76_v37 = vpop.xlane.xlu1 %75 }
 0x145   :  { %v82_v39 = vsel %vm38_vm0, %v76_v37, 0.0 }
 0x148   :  { %v81_v38 = vpop.xlane.xlu1 %80 }
 0x149   :  { %v83_v40 = vsel %vm38_vm0, %v81_v38, 0.0 }
 0x14a   :  { %v84_v41 = vadd.f32 %v83_v40, %v82_v39 }
 0x14c   :  { %v85_v42 = vmul.f32 0.001953125, %v84_v41  ;;  %v108_v47 = vpop.permute.xlu1 %107 }
 0x14d   :  { %v115_v50 = vrot.slane %v108_v47, %v59_v19 }
 0x14e   :  { %v86_v43 = vadd.f32 1e-05, %v85_v42 }
 0x150   :  { %144 = vrsqrt.f32 %v86_v43 }
 0x15a   :  { %v145_v45 = vpop.eup %144 }
 0x15b   :  { %v89_v46 = vmul.f32 %v145_v45, %v88_v44 }
 0x15d   :  { %92 = vperm.xlu0 %140, %v89_v46  }
 0x1dc   :  { %v93_v48 = vpop.permute.xlu0 %92 }
 0x1dd   :  { %v100_v49 = vrot.slane %v93_v48, %v59_v19 }
 0x1df   :  { %v102_v51 = vmul.f32 %v100_v49, %v62_v24  ;;  %v103_v52 = vmul.f32 %v100_v49, %v63_v23 }
 0x1e1   :  { %v117_v55 = vadd.f32 %v115_v50, %v102_v51  ;;  %v118_v56 = vadd.f32 %v115_v50, %v103_v52 }
 0x1e3   :  { %vm121_vm1 = vcmp.ge.f32.partialorder %v117_v55, 0.0  ;;  %vm122_vm2 = vcmp.ge.f32.partialorder %v118_v56, 0.0 }
 0x1e4   :  { %v125_v57 = vsel %vm121_vm1, %v123_v53, %v124_v54  ;;  %v126_v58 = vsel %vm122_vm2, %v123_v53, %v124_v54 }
 0x1e5   :  { %v127_v59 = vmul.f32 %v125_v57, %v117_v55  ;;  %v128_v60 = vmul.f32 %v126_v58, %v118_v56 }
 0x1e7   :  { %129 = vst [vmem:[%s225_s4] sm:$0xff] %v127_v59  ;;  %130 = vst [vmem:[%s225_s4 + $0x8] sm:$0xff] %v128_v60 }
 0x1e8   :  { %135 = vsyncpa [#allocation3], 1 }

</bundles_post_ra>
